<compile_context>
chip_gen: v5e
topology: v5e:2x2
jax: 0.10.0
libtpu: 0.0.40
codegen_flags: <defaults>
</compile_context>

<pallas_src>
import jax
import jax.numpy as jnp
from jax.experimental import pallas as pl
from jax.experimental.pallas import tpu as pltpu


def attention_pooling_kernel(emb_ref, mask_ref, w_ref, out_ref):
    """One batch tile: scores = emb @ w, masked softmax over seq, weighted sum."""
    # Upcast in-register (free) rather than in the wrapper (which would double
    # HBM traffic on the dominant operand).
    emb = emb_ref[...].astype(jnp.float32)        # [TB, S, H]
    mask = mask_ref[...]                          # [TB, S] int32 (1 valid, 0 pad)
    w = w_ref[...].astype(jnp.float32)            # [1, H]

    # scores = attention_layer(emb).squeeze(-1): VPU multiply + lane reduce.
    # (An N=1 MXU matvec wastes the systolic array and emits lane-width-1
    #  results; the VPU/XLU path hides entirely under the DMA shadow.)
    scores = jnp.sum(emb * w[None, :, :], axis=-1)            # [TB, S]

    # masked_fill(mask == 0, -inf), but with a large finite negative so that
    # fully-masked rows don't hit -inf - (-inf) = NaN or 0/0.
    neg_big = jnp.float32(-1e30)
    scores = jnp.where(mask == 0, neg_big, scores)

    # Numerically-stable softmax over the sequence dim.
    m = jnp.max(scores, axis=1, keepdims=True)                 # [TB, 1]
    e = jnp.exp(scores - m)                                    # [TB, S]
    denom = jnp.maximum(jnp.sum(e, axis=1, keepdims=True), jnp.float32(1e-30))
    attn = e * pl.reciprocal(denom, approx=True)               # EUP slot ~ free

    # sum(attn_weights * embeddings, dim=1) -> [TB, H].
    # Kept on the VPU/XLU: the kernel is HBM-bound on all chips, so the MXU
    # would add nothing (and M=1-per-row batched dots waste the array anyway).
    pooled = jnp.sum(attn[:, :, None] * emb, axis=1)           # [TB, H]
    out_ref[...] = pooled.astype(out_ref.dtype)


def _choose_batch_tile(B, S, H, target_f32_bytes=4 << 20):
    """Largest batch tile whose f32 compute footprint is ~<= 4 MiB.

    The DMA block is then <= 4 MiB (f32 input) / <= 2 MiB (bf16 input); with
    2x double-buffering plus in-kernel f32 temporaries this stays well inside
    the 32 MiB scoped-VMEM default (incl. v7x, whose physical VMEM is 64 MiB).
    """
    row_bytes = max(1, S * H * 4)
    tb = max(1, target_f32_bytes // row_bytes)
    if tb >= B:
        return B                      # whole batch fits in one block
    # tb < B: the (tb, S) mask block and (tb, H) output block put tb on the
    # sublane axis, so it must be a multiple of 8 (wrapper pads B to match).
    return max(8, (tb // 8) * 8)


def attention_pooling(embeddings, attention_mask, weight,
                      selected_token_indices=None, batch_tile=None):
    """JAX wrapper mirroring AttentionPooling.forward."""
    if selected_token_indices is not None:
        # torch.gather along the seq dim (glue, not the hot path).
        embeddings = jnp.take_along_axis(
            embeddings, selected_token_indices[:, :, None], axis=1)
        attention_mask = jnp.ones(embeddings.shape[:2], dtype=jnp.int32)

    B, S, H = embeddings.shape
    mask = attention_mask.astype(jnp.int32)
    weight = weight.reshape(1, H)

    tb = batch_tile if batch_tile is not None else _choose_batch_tile(B, S, H)
    if tb >= B:
        tb, Bp = B, B
    else:
        tb = max(8, (tb // 8) * 8)              # sublane alignment for tb < B
        Bp = ((B + tb - 1) // tb) * tb
    if Bp != B:
        # Zero-pad the batch; padded rows are fully masked (the in-kernel
        # guard keeps them finite) and are sliced off below.
        pad = Bp - B
        embeddings = jnp.pad(embeddings, ((0, pad), (0, 0), (0, 0)))
        mask = jnp.pad(mask, ((0, pad), (0, 0)))

    grid = (Bp // tb,)

    # TODO(synk): for very long S add a second ("arbitrary") grid axis over the
    # sequence with an online-softmax accumulator in VMEM scratch.
    out = pl.pallas_call(
        attention_pooling_kernel,
        out_shape=jax.ShapeDtypeStruct((Bp, H), embeddings.dtype),
        grid=grid,
        in_specs=[
            pl.BlockSpec((tb, S, H), lambda b: (b, 0, 0)),
            pl.BlockSpec((tb, S), lambda b: (b, 0)),
            pl.BlockSpec((1, H), lambda b: (0, 0)),
        ],
        out_specs=pl.BlockSpec((tb, H), lambda b: (b, 0)),
        compiler_params=pltpu.CompilerParams(
            dimension_semantics=("parallel",)),
    )(embeddings, mask, weight)
    return out[:B] if Bp != B else out


def _reference(embeddings, attention_mask, weight):
    emb = embeddings.astype(jnp.float32)
    scores = jnp.einsum("bsh,oh->bs", emb, weight.astype(jnp.float32))
    scores = jnp.where(attention_mask == 0, -jnp.inf, scores)
    attn = jax.nn.softmax(scores, axis=1)[:, :, None]
    return jnp.sum(attn * emb, axis=1)


if __name__ == "__main__":
    B, S, H = 2, 8, 32
    key = jax.random.PRNGKey(0)
    k_emb, k_w, k_big, k_mask = jax.random.split(key, 4)

    # bf16 embeddings: the wrapper never upcasts, so HBM traffic stays bf16.
    embeddings = jax.random.normal(k_emb, (B, S, H), dtype=jnp.float32)
    embeddings = embeddings.astype(jnp.bfloat16)
    # nn.Linear(hidden_dim, 1, bias=False) weight: shape [1, H]
    weight = jax.random.uniform(
        k_w, (1, H), dtype=jnp.float32,
        minval=-1.0 / jnp.sqrt(H), maxval=1.0 / jnp.sqrt(H))
    # mask: first sequence has 6 valid tokens, second has all 8
    attention_mask = jnp.array(
        [[1, 1, 1, 1, 1, 1, 0, 0],
         [1, 1, 1, 1, 1, 1, 1, 1]], dtype=jnp.int32)

    out = jax.block_until_ready(
        attention_pooling(embeddings, attention_mask, weight))
    ref = _reference(embeddings, attention_mask, weight)
    assert out.shape == (B, H)
    assert out.dtype == embeddings.dtype
    assert jnp.allclose(out.astype(jnp.float32), ref, atol=2e-2, rtol=2e-2)

    # Fully-masked rows stay finite (the -inf path would have produced NaN).
    zero_mask = attention_mask.at[0].set(0)
    out_masked = jax.block_until_ready(
        attention_pooling(embeddings, zero_mask, weight))
    assert bool(jnp.all(jnp.isfinite(out_masked.astype(jnp.float32))))

    # selected_token_indices path (torch.gather equivalent).
    sel = jnp.array([[0, 2, 4, 5], [1, 3, 5, 7]], dtype=jnp.int32)
    out_sel = jax.block_until_ready(
        attention_pooling(embeddings, attention_mask, weight,
                          selected_token_indices=sel))
    emb_sel = jnp.take_along_axis(embeddings, sel[:, :, None], axis=1)
    ref_sel = _reference(emb_sel, jnp.ones(emb_sel.shape[:2], jnp.int32), weight)
    assert jnp.allclose(out_sel.astype(jnp.float32), ref_sel,
                        atol=2e-2, rtol=2e-2)

    # Exercise the tiled + batch-padded path (B=20 not divisible by tile=8).
    Bb, Sb, Hb = 20, 16, 128
    emb_big = jax.random.normal(k_big, (Bb, Sb, Hb), dtype=jnp.float32)
    mask_big = jax.random.bernoulli(k_mask, 0.8, (Bb, Sb)).astype(jnp.int32)
    mask_big = mask_big.at[:, 0].set(1)     # at least one valid token per row
    w_big = jax.random.uniform(
        k_w, (1, Hb), dtype=jnp.float32,
        minval=-1.0 / jnp.sqrt(Hb), maxval=1.0 / jnp.sqrt(Hb))
    out_big = jax.block_until_ready(
        attention_pooling(emb_big, mask_big, w_big, batch_tile=8))
    ref_big = _reference(emb_big, mask_big, w_big)
    assert out_big.shape == (Bb, Hb)
    assert jnp.allclose(out_big, ref_big, atol=2e-3, rtol=2e-3)

    print("KERNEL_OK")
</pallas_src>

<mosaic_0001>
module attributes {stable_mosaic.version = 11 : i64} {
  func.func @attention_pooling_kernel(%arg0: i32, %arg1: memref<2x8x32xbf16, #tpu.memory_space<vmem>>, %arg2: memref<2x8xi32, #tpu.memory_space<vmem>>, %arg3: memref<1x32xf32, #tpu.memory_space<vmem>>, %arg4: memref<2x32xbf16, #tpu.memory_space<vmem>>) attributes {dimension_semantics = [#tpu.dimension_semantics<parallel>], iteration_bounds = array<i64: 1>, scalar_prefetch = 0 : i64, scratch_operands = 0 : i64, tpu.core_type = #tpu.core_type<tc>, window_params = [{transform_indices = @transform_0, window_bounds = array<i64: 2, 8, 32>}, {transform_indices = @transform_1, window_bounds = array<i64: 2, 8>}, {pipeline_mode = #tpu.pipeline_mode<synchronous>, transform_indices = @transform_2, window_bounds = array<i64: 1, 32>}, {transform_indices = @transform_3, window_bounds = array<i64: 2, 32>}]} {
    %c0 = arith.constant 0 : index
    %c0_0 = arith.constant 0 : index
    %c0_1 = arith.constant 0 : index
    %0 = vector.load %arg1[%c0, %c0_0, %c0_1] : memref<2x8x32xbf16, #tpu.memory_space<vmem>>, vector<2x8x32xbf16>
    %1 = arith.extf %0 : vector<2x8x32xbf16> to vector<2x8x32xf32>
    %c0_2 = arith.constant 0 : index
    %c0_3 = arith.constant 0 : index
    %2 = vector.load %arg2[%c0_2, %c0_3] : memref<2x8xi32, #tpu.memory_space<vmem>>, vector<2x8xi32>
    %c0_4 = arith.constant 0 : index
    %c0_5 = arith.constant 0 : index
    %3 = vector.load %arg3[%c0_4, %c0_5] : memref<1x32xf32, #tpu.memory_space<vmem>>, vector<1x32xf32>
    %4 = vector.shape_cast %3 : vector<1x32xf32> to vector<1x1x32xf32>
    %5 = vector.broadcast %4 : vector<1x1x32xf32> to vector<2x8x32xf32>
    %6 = arith.mulf %1, %5 : vector<2x8x32xf32>
    %cst = arith.constant dense<0.000000e+00> : vector<2x8xf32>
    %7 = vector.multi_reduction <add>, %6, %cst [2] : vector<2x8x32xf32> to vector<2x8xf32>
    %c0_i32 = arith.constant 0 : i32
    %8 = vector.broadcast %c0_i32 : i32 to vector<2x8xi32>
    %9 = arith.cmpi eq, %2, %8 : vector<2x8xi32>
    %cst_6 = arith.constant -1.000000e+30 : f32
    %10 = vector.broadcast %cst_6 : f32 to vector<2x8xf32>
    %11 = arith.select %9, %10, %7 : vector<2x8xi1>, vector<2x8xf32>
    %cst_7 = arith.constant dense<0xFF800000> : vector<2xf32>
    %12 = vector.multi_reduction <maximumf>, %11, %cst_7 [1] : vector<2x8xf32> to vector<2xf32>
    %13 = vector.shape_cast %12 : vector<2xf32> to vector<2x1xf32>
    %14 = vector.broadcast %13 : vector<2x1xf32> to vector<2x8xf32>
    %15 = arith.subf %11, %14 : vector<2x8xf32>
    %16 = math.exp %15 : vector<2x8xf32>
    %cst_8 = arith.constant dense<0.000000e+00> : vector<2xf32>
    %17 = vector.multi_reduction <add>, %16, %cst_8 [1] : vector<2x8xf32> to vector<2xf32>
    %18 = vector.shape_cast %17 : vector<2xf32> to vector<2x1xf32>
    %cst_9 = arith.constant 1.000000e-30 : f32
    %19 = vector.broadcast %cst_9 : f32 to vector<2x1xf32>
    %20 = arith.maximumf %18, %19 : vector<2x1xf32>
    %21 = tpu.reciprocal %20 {approx = true} : vector<2x1xf32> -> vector<2x1xf32>
    %22 = vector.broadcast %21 : vector<2x1xf32> to vector<2x8xf32>
    %23 = arith.mulf %16, %22 : vector<2x8xf32>
    %24 = vector.shape_cast %23 : vector<2x8xf32> to vector<2x8x1xf32>
    %25 = vector.broadcast %24 : vector<2x8x1xf32> to vector<2x8x32xf32>
    %26 = arith.mulf %25, %1 : vector<2x8x32xf32>
    %cst_10 = arith.constant dense<0.000000e+00> : vector<2x32xf32>
    %27 = vector.multi_reduction <add>, %26, %cst_10 [1] : vector<2x8x32xf32> to vector<2x32xf32>
    %28 = arith.truncf %27 : vector<2x32xf32> to vector<2x32xbf16>
    %c0_11 = arith.constant 0 : index
    %c0_12 = arith.constant 0 : index
    %29 = vector.load %arg4[%c0_11, %c0_12] : memref<2x32xbf16, #tpu.memory_space<vmem>>, vector<2x32xbf16>
    tpu.vector_store %arg4[%c0_11, %c0_12], %28 {strides = array<i32>} : memref<2x32xbf16, #tpu.memory_space<vmem>>, vector<2x32xbf16>,
    return
  }
  func.func @transform_0(%arg0: i32) -> (i32, i32, i32) {
    %c0_i32 = arith.constant 0 : i32
    %c0_i32_0 = arith.constant 0 : i32
    %c0_i32_1 = arith.constant 0 : i32
    return %arg0, %c0_i32, %c0_i32_0 : i32, i32, i32
  }
  func.func @transform_1(%arg0: i32) -> (i32, i32) {
    %c0_i32 = arith.constant 0 : i32
    %c0_i32_0 = arith.constant 0 : i32
    return %arg0, %c0_i32 : i32, i32
  }
  func.func @transform_2(%arg0: i32) -> (i32, i32) {
    %c0_i32 = arith.constant 0 : i32
    %c0_i32_0 = arith.constant 0 : i32
    %c0_i32_1 = arith.constant 0 : i32
    return %c0_i32, %c0_i32_0 : i32, i32
  }
  func.func @transform_3(%arg0: i32) -> (i32, i32) {
    %c0_i32 = arith.constant 0 : i32
    %c0_i32_0 = arith.constant 0 : i32
    return %arg0, %c0_i32 : i32, i32
  }
}

</mosaic_0001>

<bundles_post_ra>
// kernel: tpu_custom_call.1
= control target key start
LH: loop header
LB: loop body
LE: loop exit
PB: predicated region body
PF: predicated region fallthrough
CT: control target
= control target key end

     0   :  { %8 = vsyncpa [#allocation3], 0  ;;  %s307_s0 = inlined_call_operand.hbm [shape: bf16[2,8,32], index: 0, kind: input, shape index: {}]   ;;  %s308_s1 = inlined_call_operand.hbm [shape: s32[2,8], index: 1, kind: input, shape index: {}]   ;;  %s309_s2 = inlined_call_operand.vmem [shape: f32[1,32], index: 2, kind: input, shape index: {}]   ;;  %s310_s3 = inlined_call_operand.hbm [shape: bf16[2,32], index: 3, kind: output, shape index: {}]  }
   0x1   :  { %9 = vsyncpa [#allocation6], 0 }
   0x2   :  { %10 = vsyncpa [#allocation4], 0  ;;  %s15_s14 = sshll.u32 %s307_s0, 4  ;;  %s261_s15 = smov [#allocation2]   ;;  %s16_s14 = int_to_ptr.hbm [resolvable:$true] %s15_s14 }
   0x3   :  { %s17_s16 = sshll.u32 %s261_s15, 4  ;;  %s29_s19 = sshll.u32 %s308_s1, 4  ;;  %s18_s16 = int_to_ptr.vmem [resolvable:$true] %s17_s16  ;;  %s30_s19 = int_to_ptr.hbm [resolvable:$true] %s29_s19 }
   0x4   :  { %s262_s20 = smov 64   ;;  %s263_s21 = smov 4  }
   0x5   :  { %23 = dma.hbm_to_vmem [thread:$0]  %s16_s14, 128, %s18_s16, [#allocation3], %s262_s20, %s262_s20, %s263_s21  }
   0x6   :  { %s264_s22 = smov [#allocation5]  }
   0x7   :  { %s31_s23 = sshll.u32 %s264_s22, 4  ;;  %s32_s23 = int_to_ptr.vmem [resolvable:$true] %s31_s23 }
   0x8   :  { %34 = dma.hbm_to_vmem [thread:$0]  %s30_s19, 32, %s32_s23, [#allocation6]  }
   0x9   :  { %255 = dma.done.wait [#allocation3], 128  }
   0xa   :  { %256 = vsyncadd [#allocation3], 4294967168 }
   0xb   :  { %257 = dma.done.wait [#allocation6], 32  }
   0xc   :  { %258 = vsyncadd [#allocation6], 4294967264  ;;  %v168_v0 = vld [vmem:[#allocation2] sm:$0xff]   ;;  %v178_v1 = vld [vmem:[%s309_s2] ss:$0 sm:$0xff]  ;;  %vm56_vm0 = vcmask 261120   ;;  %v66_v9 = vlaneseq }
   0xd   :  { %v169_v2 = vunpack.c.l.bf16 %v168_v0  ;;  %v170_v4 = vunpack.c.h.bf16 %v168_v0  ;;  %v49_v11 = vld [vmem:[#allocation5] sm:$0x3]  ;;  %vm70_vm1 = vcmask 1041409   ;;  %vm74_vm3 = vcmask 58368   ;;  %s265_s1 = smov [#allocation7]   ;;  %s156_s27 = sshll.u32 %s310_s3, 4  ;;  %s157_s27 = int_to_ptr.hbm [resolvable:$true] %s156_s27 }
   0xe   :  { %v67_v10 = vand.u32 127, %v66_v9  ;;  %vm63_vm2 = vcmp.eq.s32.totalorder %v49_v11, 0  ;;  %v89_v23 = vshrl.u32 %v66_v9, 7  ;;  %vm123_vm4 = vcmask 1040384   ;;  %s154_s2 = sshll.u32 %s265_s1, 4  ;;  %s155_s2 = int_to_ptr.vmem [resolvable:$true] %s154_s2 }
   0xf   :  { %v54_v3 = vmul.f32 %v178_v1, %v169_v2  ;;  %v55_v6 = vmul.f32 %v178_v1, %v170_v4  ;;  %vm147_vm5 = vcmask 253952  }
  0x10   :  { %176 = vset.pattern.permute.xlu2 %v89_v23  ;;  %177 = vset.pattern.permute.xlu0 %v89_v23 }
  0x11   :  { %v57_v5 = vsel %vm56_vm0, %v54_v3, 0.0  ;;  %v60_v7 = vsel %vm56_vm0, %v55_v6, 0.0 }
  0x12   :  { %58 = vadd.xlane.f32.xlu0 %v57_v5 }
  0x1a   :  { %61 = vadd.xlane.f32.xlu0 %v60_v7 }
  0x85   :  { %v59_v8 = vpop.xlane.xlu0 %58 }
  0x86   :  { %v68_v13 = vperm.slane %v59_v8, %v67_v10 }
  0x8d   :  { %v62_v12 = vpop.xlane.xlu0 %61 }
  0x8e   :  { %v69_v14 = vperm.slane %v62_v12, %v67_v10 }
  0x90   :  { %v71_v15 = vsel %vm70_vm1, %v69_v14, %v68_v13 }
  0x91   :  { %v73_v16 = vsel %vm63_vm2, -1e+30, %v71_v15 }
  0x92   :  { %v75_v17 = vsel %vm74_vm3, %v73_v16, -inf }
  0x93   :  { %76 = vmax.xlane.f32.xlu1 %v75_v17 }
 0x106   :  { %v77_v18 = vpop.xlane.xlu1 %76 }
 0x107   :  { %v78_v19 = vsub.f32 %v73_v16, %v77_v18 }
 0x109   :  { %v79_v20 = vmul.f32 1.442695, %v78_v19 }
 0x10b   :  { %179 = vpow2.f32 %v79_v20 }
 0x111   :  { %v180_v21 = vpop.eup %179 }
 0x112   :  { %v81_v22 = vsel %vm74_vm3, %v180_v21, 0.0 }
 0x113   :  { %82 = vadd.xlane.f32.xlu1 %v81_v22 }
 0x186   :  { %v83_v24 = vpop.xlane.xlu1 %82 }
 0x187   :  { %v84_v25 = vmax.f32 %v83_v24, 1e-30 }
 0x189   :  { %181 = vrcp.f32 %v84_v25 }
 0x18f   :  { %v182_v26 = vpop.eup %181 }
 0x190   :  { %v86_v27 = vmul.f32 %v182_v26, %v180_v21 }
 0x192   :  { %v94_v28 = vperm.slane %v86_v27, 1  ;;  %v87_v29 = vperm.slane %v86_v27, 0 }
 0x194   :  { %99 = vperm.xlu2 %176, %v94_v28  }
 0x19c   :  { %92 = vperm.xlu2 %176, %v87_v29  }
 0x1ee   :  { %v100_v30 = vpop.permute.xlu2 %99 }
 0x1ef   :  { %v102_v31 = vmul.f32 %v170_v4, %v100_v30 }
 0x1f1   :  { %v110_v32 = vsel %vm56_vm0, %v102_v31, 0.0 }
 0x1f2   :  { %v111_v33 = vrot.slane %v110_v32, 4 }
 0x1f4   :  { %v112_v34 = vadd.f32 %v111_v33, %v110_v32 }
 0x1f6   :  { %v113_v35 = vrot.slane %v112_v34, 2  ;;  %v93_v36 = vpop.permute.xlu2 %92 }
 0x1f7   :  { %v101_v37 = vmul.f32 %v169_v2, %v93_v36 }
 0x1f8   :  { %v114_v38 = vadd.f32 %v113_v35, %v112_v34 }
 0x1f9   :  { %v103_v39 = vsel %vm56_vm0, %v101_v37, 0.0 }
 0x1fa   :  { %v115_v40 = vrot.slane %v114_v38, 1  ;;  %v104_v41 = vrot.slane %v103_v39, 4 }
 0x1fc   :  { %v116_v42 = vadd.f32 %v115_v40, %v114_v38  ;;  %v105_v43 = vadd.f32 %v104_v41, %v103_v39 }
 0x1fe   :  { %v118_v44 = vpack.c.bf16 %v116_v42, %v116_v42  ;;  %v106_v45 = vrot.slane %v105_v43, 2 }
 0x200   :  { %v122_v46 = vrot.slane %v118_v44, 3  ;;  %v107_v47 = vadd.f32 %v106_v45, %v105_v43 }
 0x202   :  { %v108_v48 = vrot.slane %v107_v47, 1  ;;  %v129_v49 = vsel %vm123_vm4, %v118_v44, %v122_v46 }
 0x203   :  { %134 = vst [vmem:[#allocation1 + $0x20] ss:$4 sm:$0xff] %v129_v49 }
 0x204   :  { %v109_v50 = vadd.f32 %v108_v48, %v107_v47 }
 0x206   :  { %v117_v51 = vpack.c.bf16 %v109_v50, %v109_v50 }
 0x208   :  { %v121_v52 = vrot.slane %v117_v51, 3 }
 0x20a   :  { %v126_v53 = vsel %vm123_vm4, %v117_v51, %v121_v52  ;;  %v135_v54 = vld [vmem:[#allocation1 + $0x20] sm:$0xf] }
 0x20b   :  { %130 = vst [vmem:[#allocation1] ss:$4 sm:$0xff] %v126_v53  ;;  %v138_v55 = vunpack.c.l.b16 %v135_v54 }
 0x20d   :  { %v139_v58 = vrot.slane %v138_v55, 7 }
 0x212   :  { %v131_v56 = vld [vmem:[#allocation1] sm:$0xf] }
 0x213   :  { %v137_v57 = vunpack.c.l.b16 %v131_v56 }
 0x215   :  { %v140_v59 = vsel %vm70_vm1, %v139_v58, %v137_v57 }
 0x216   :  { %v141_v60 = vpack.c.b16 %v140_v59, %v140_v59 }
 0x218   :  { %v142_v61 = vrot.slane %v141_v60, 3 }
 0x21a   :  { %v145_v62 = vsel %vm123_vm4, %v141_v60, %v142_v61 }
 0x21b   :  { %148 = vst.msk [vmem:[#allocation7] sm:$0x1] %vm147_vm5, %v145_v62 }
 0x21c   :  { %159 = dma.vmem_to_hbm [thread:$0]  %s155_s2, 16, %s157_s27, [#allocation4]  }
 0x21d   :  { %259 = dma.done.wait [#allocation4], 16  }
 0x21e   :  { %260 = vsyncadd [#allocation4], 4294967280 }
 0x21f   :  { %164 = vsyncpa [#allocation3], 1 }
 0x220   :  { %165 = vsyncpa [#allocation6], 1 }
 0x221   :  { %166 = vsyncpa [#allocation4], 1 }

</bundles_post_ra>
